<compile_context>
chip_gen: v7x
topology: tpu7x:2x2x1
jax: 0.10.0
libtpu: 0.0.40
codegen_flags: <defaults>
</compile_context>

<pallas_src>
import functools

import jax
import jax.numpy as jnp
from jax import lax
from jax.experimental import pallas as pl
from jax.experimental.pallas import tpu as pltpu

NEG_BIG = -1e30  # bias for padded tag columns -> exp() == 0 inside log_softmax


def _round_up(n, m):
    return ((n + m - 1) // m) * m


def _sigmoid(z):
    return 1.0 / (1.0 + jnp.exp(-z))


# ---------------------------------------------------------------------------
# Kernel 1: single-layer LSTM recurrence. grid = (T,), sequential ("arbitrary").
# h / c live in VMEM scratch and persist across grid steps (P3/P4 pattern).
# ---------------------------------------------------------------------------
def _lstm_step_kernel(x_ref, len_ref, wih_ref, whh_ref, b_ref, out_ref,
                      h_scr, c_scr, *, hp):
    t = pl.program_id(0)

    @pl.when(t == 0)
    def _():
        h_scr[...] = jnp.zeros_like(h_scr)
        c_scr[...] = jnp.zeros_like(c_scr)

    x_t = x_ref[0]                       # (Bp, Dp), compute dtype
    h_prev = h_scr[...]                  # (Bp, Hp), f32

    gates = (
        jnp.dot(x_t, wih_ref[...], preferred_element_type=jnp.float32)
        + jnp.dot(h_prev.astype(whh_ref.dtype), whh_ref[...],
                  preferred_element_type=jnp.float32)
        + b_ref[...]
    )                                    # (Bp, 4*Hp), f32

    # PyTorch gate order: i, f, g, o; gate blocks are padded to Hp boundaries.
    i = _sigmoid(gates[:, 0 * hp:1 * hp])
    f = _sigmoid(gates[:, 1 * hp:2 * hp])
    g = jnp.tanh(gates[:, 2 * hp:3 * hp])
    o = _sigmoid(gates[:, 3 * hp:4 * hp])

    c = f * c_scr[...] + i * g
    h = o * jnp.tanh(c)
    h_scr[...] = h
    c_scr[...] = c

    valid = len_ref[...] > t             # (Bp, 1), broadcasts over Hp
    out_ref[0] = jnp.where(valid, h, 0.0).astype(out_ref.dtype)


# ---------------------------------------------------------------------------
# Kernel 2: tag projection + log_softmax over the flattened (T*B) rows.
# ---------------------------------------------------------------------------
def _proj_logsoftmax_kernel(h_ref, w_ref, b_ref, o_ref):
    logits = (jnp.dot(h_ref[...], w_ref[...],
                      preferred_element_type=jnp.float32) + b_ref[...])
    m = jnp.max(logits, axis=-1, keepdims=True)
    lse = m + jnp.log(jnp.sum(jnp.exp(logits - m), axis=-1, keepdims=True))
    o_ref[...] = (logits - lse).astype(o_ref.dtype)


def _vmem_budget(block_nbytes, scratch_nbytes=0):
    # Every in/out block is double-buffered by the BlockSpec pipeline; add
    # slack for compiler-internal scratch and stay below v7x's 64 MiB VMEM.
    need = 2 * sum(block_nbytes) + scratch_nbytes + (8 << 20)
    return int(min(max(need, 8 << 20), 60 << 20))


@functools.partial(jax.jit, static_argnames=("use_bf16",))
def rnn_tagger_forward(x, lengths, params, use_bf16=False):
    """x: (B, T, D) f32; lengths: (B,) int; params in PyTorch LSTM/Linear layout."""
    B, T, D = x.shape
    H = params["W_hh"].shape[1]
    n_tags = params["W_out"].shape[0]
    cdtype = jnp.bfloat16 if use_bf16 else jnp.float32
    fsize = jnp.dtype(cdtype).itemsize

    # lane/sublane-dense padded sizes
    Bp = _round_up(B, 16)
    Dp = _round_up(D, 128)
    Hp = _round_up(H, 128)
    Np = _round_up(n_tags, 128)

    # ---- layout plumbing (static shapes, done in the wrapper) --------------
    xt = jnp.transpose(x, (1, 0, 2))                        # (T, B, D)
    x_pad = jnp.zeros((T, Bp, Dp), cdtype).at[:, :B, :D].set(xt.astype(cdtype))

    # LSTM weights pre-transposed (x @ W) and padded gate-wise to Hp blocks.
    wih_t = jnp.zeros((Dp, 4 * Hp), cdtype)
    whh_t = jnp.zeros((Hp, 4 * Hp), cdtype)
    bias = jnp.zeros((1, 4 * Hp), jnp.float32)
    b_sum = (params["b_ih"] + params["b_hh"]).astype(jnp.float32)
    for gidx in range(4):
        wih_t = wih_t.at[:D, gidx * Hp:gidx * Hp + H].set(
            params["W_ih"][gidx * H:(gidx + 1) * H, :].T.astype(cdtype))
        whh_t = whh_t.at[:H, gidx * Hp:gidx * Hp + H].set(
            params["W_hh"][gidx * H:(gidx + 1) * H, :].T.astype(cdtype))
        bias = bias.at[0, gidx * Hp:gidx * Hp + H].set(
            b_sum[gidx * H:(gidx + 1) * H])

    # Tag projection, lane-dense padded; padded tag columns get a -1e30 bias.
    wout_t = jnp.zeros((Hp, Np), cdtype).at[:H, :n_tags].set(
        params["W_out"].T.astype(cdtype))
    bout = jnp.full((1, Np), NEG_BIG, jnp.float32).at[0, :n_tags].set(
        params["b_out"].astype(jnp.float32))

    len_pad = jnp.zeros((Bp, 1), jnp.int32).at[:B, 0].set(
        lengths.astype(jnp.int32))

    # ---- LSTM recurrence ----------------------------------------------------
    blk1 = [Bp * Dp * fsize, Bp * 4, Dp * 4 * Hp * fsize,
            Hp * 4 * Hp * fsize, 4 * Hp * 4, Bp * Hp * fsize]
    hidden = pl.pallas_call(
        functools.partial(_lstm_step_kernel, hp=Hp),
        out_shape=jax.ShapeDtypeStruct((T, Bp, Hp), cdtype),
        grid_spec=pltpu.PrefetchScalarGridSpec(
            num_scalar_prefetch=0,
            grid=(T,),
            in_specs=[
                pl.BlockSpec((1, Bp, Dp), lambda t: (t, 0, 0)),
                pl.BlockSpec((Bp, 1), lambda t: (0, 0)),
                pl.BlockSpec((Dp, 4 * Hp), lambda t: (0, 0)),
                pl.BlockSpec((Hp, 4 * Hp), lambda t: (0, 0)),
                pl.BlockSpec((1, 4 * Hp), lambda t: (0, 0)),
            ],
            out_specs=pl.BlockSpec((1, Bp, Hp), lambda t: (t, 0, 0)),
            scratch_shapes=[pltpu.VMEM((Bp, Hp), jnp.float32),
                            pltpu.VMEM((Bp, Hp), jnp.float32)],
        ),
        compiler_params=pltpu.CompilerParams(
            dimension_semantics=("arbitrary",),
            vmem_limit_bytes=_vmem_budget(blk1, 2 * Bp * Hp * 4)),
    )(x_pad, len_pad, wih_t, whh_t, bias)

    # ---- projection + log_softmax over all (T*Bp) rows ----------------------
    # TODO(synk): for very long sequences the LSTM could also block over T in
    # chunks with manual DMA prefetch; the recurrence itself stays sequential.
    R = T * Bp
    tr = 256 if R >= 256 else _round_up(R, 16)
    Rp = _round_up(R, tr)
    h_rows = hidden.reshape(R, Hp)
    if Rp != R:
        h_rows = jnp.zeros((Rp, Hp), cdtype).at[:R].set(h_rows)

    blk2 = [tr * Hp * fsize, Hp * Np * fsize, Np * 4, tr * Np * 4]
    scores_pad = pl.pallas_call(
        _proj_logsoftmax_kernel,
        out_shape=jax.ShapeDtypeStruct((Rp, Np), jnp.float32),
        grid_spec=pltpu.PrefetchScalarGridSpec(
            num_scalar_prefetch=0,
            grid=(Rp // tr,),
            in_specs=[
                pl.BlockSpec((tr, Hp), lambda i: (i, 0)),
                pl.BlockSpec((Hp, Np), lambda i: (0, 0)),
                pl.BlockSpec((1, Np), lambda i: (0, 0)),
            ],
            out_specs=pl.BlockSpec((tr, Np), lambda i: (i, 0)),
        ),
        compiler_params=pltpu.CompilerParams(
            dimension_semantics=("parallel",),
            vmem_limit_bytes=_vmem_budget(blk2)),
    )(h_rows, wout_t, bout)

    # (Rp, Np) -> (B, T, n_tags), matching PyTorch's output layout.
    scores = scores_pad[:R].reshape(T, Bp, Np)
    scores = jnp.transpose(scores, (1, 0, 2))[:B, :, :n_tags]
    return scores


# ---------------------------------------------------------------------------
# Parameter init (PyTorch defaults: U(-1/sqrt(H), 1/sqrt(H)) for LSTM & Linear)
# and a pure-JAX reference for the correctness check.
# ---------------------------------------------------------------------------
def init_rnn_tagger_params(key, input_dim, hidden, n_tags):
    ks = jax.random.split(key, 6)
    bound = 1.0 / jnp.sqrt(hidden)
    u = lambda k, shape: jax.random.uniform(k, shape, jnp.float32, -bound, bound)
    return {
        "W_ih": u(ks[0], (4 * hidden, input_dim)),
        "W_hh": u(ks[1], (4 * hidden, hidden)),
        "b_ih": u(ks[2], (4 * hidden,)),
        "b_hh": u(ks[3], (4 * hidden,)),
        "W_out": u(ks[4], (n_tags, hidden)),
        "b_out": u(ks[5], (n_tags,)),
    }


def rnn_tagger_reference(x, lengths, params):
    B, T, D = x.shape
    H = params["W_hh"].shape[1]
    wih_t, whh_t = params["W_ih"].T, params["W_hh"].T
    b = params["b_ih"] + params["b_hh"]

    def step(carry, x_t):
        h, c = carry
        gates = x_t @ wih_t + h @ whh_t + b
        i, f, g, o = jnp.split(gates, 4, axis=-1)
        i, f, o = _sigmoid(i), _sigmoid(f), _sigmoid(o)
        g = jnp.tanh(g)
        c = f * c + i * g
        h = o * jnp.tanh(c)
        return (h, c), h

    h0 = jnp.zeros((B, H), jnp.float32)
    c0 = jnp.zeros((B, H), jnp.float32)
    _, hs = lax.scan(step, (h0, c0), jnp.transpose(x, (1, 0, 2)))   # (T, B, H)
    valid = (jnp.arange(T)[:, None] < lengths[None, :])[..., None]
    hs = jnp.where(valid, hs, 0.0)
    hs = jnp.transpose(hs, (1, 0, 2))                               # (B, T, H)
    logits = hs @ params["W_out"].T + params["b_out"]
    return jax.nn.log_softmax(logits, axis=-1)


if __name__ == "__main__":
    key = jax.random.PRNGKey(0)
    kx, kp = jax.random.split(key)

    # small shapes: batch=2, seq=8, input_dim=32, hidden=32, n_tags=5
    B, T, D, H, n_tags = 2, 8, 32, 32, 5
    x = jax.random.normal(kx, (B, T, D), jnp.float32)
    lengths = jnp.array([8, 5], jnp.int32)   # ragged, sorted descending
    params = init_rnn_tagger_params(kp, D, H, n_tags)

    ref = rnn_tagger_reference(x, lengths, params)

    # f32 operand path
    y = jax.block_until_ready(rnn_tagger_forward(x, lengths, params))
    assert y.shape == (B, T, n_tags)
    assert jnp.allclose(y, ref, atol=1e-4, rtol=1e-4)

    # bf16 MXU-operand path (f32 accumulation / element-wise), looser tolerance
    y_bf = jax.block_until_ready(
        rnn_tagger_forward(x, lengths, params, use_bf16=True))
    assert y_bf.shape == (B, T, n_tags)
    assert jnp.allclose(y_bf, ref, atol=1e-1, rtol=1e-1)

    print("KERNEL_OK")
</pallas_src>

<mosaic_0001>
module attributes {stable_mosaic.version = 11 : i64} {
  func.func @_proj_logsoftmax_kernel(%arg0: i32, %arg1: memref<128x128xf32, #tpu.memory_space<vmem>>, %arg2: memref<128x128xf32, #tpu.memory_space<vmem>>, %arg3: memref<1x128xf32, #tpu.memory_space<vmem>>, %arg4: memref<128x128xf32, #tpu.memory_space<vmem>>) attributes {dimension_semantics = [#tpu.dimension_semantics<parallel>], iteration_bounds = array<i64: 1>, scalar_prefetch = 0 : i64, scratch_operands = 0 : i64, tpu.core_type = #tpu.core_type<tc>, window_params = [{transform_indices = @transform_0, window_bounds = array<i64: 128, 128>}, {pipeline_mode = #tpu.pipeline_mode<synchronous>, transform_indices = @transform_1, window_bounds = array<i64: 128, 128>}, {pipeline_mode = #tpu.pipeline_mode<synchronous>, transform_indices = @transform_2, window_bounds = array<i64: 1, 128>}, {transform_indices = @transform_3, window_bounds = array<i64: 128, 128>}]} {
    %c0 = arith.constant 0 : index
    %c0_0 = arith.constant 0 : index
    %0 = vector.load %arg1[%c0, %c0_0] : memref<128x128xf32, #tpu.memory_space<vmem>>, vector<128x128xf32>
    %c0_1 = arith.constant 0 : index
    %c0_2 = arith.constant 0 : index
    %1 = vector.load %arg2[%c0_1, %c0_2] : memref<128x128xf32, #tpu.memory_space<vmem>>, vector<128x128xf32>
    %cst = arith.constant dense<0.000000e+00> : vector<128x128xf32>
    %2 = tpu.matmul %0, %1, %cst {dimension_numbers = #tpu.dot_dimension_numbers<[1], [0], [0], [1], [0, 0, 1, 1], [], []>} : vector<128x128xf32>, vector<128x128xf32>, vector<128x128xf32> -> vector<128x128xf32>
    %c0_3 = arith.constant 0 : index
    %c0_4 = arith.constant 0 : index
    %3 = vector.load %arg3[%c0_3, %c0_4] : memref<1x128xf32, #tpu.memory_space<vmem>>, vector<1x128xf32>
    %4 = vector.broadcast %3 : vector<1x128xf32> to vector<128x128xf32>
    %5 = arith.addf %2, %4 : vector<128x128xf32>
    %cst_5 = arith.constant dense<0xFF800000> : vector<128xf32>
    %6 = vector.multi_reduction <maximumf>, %5, %cst_5 [1] : vector<128x128xf32> to vector<128xf32>
    %7 = vector.shape_cast %6 : vector<128xf32> to vector<128x1xf32>
    %8 = vector.broadcast %7 : vector<128x1xf32> to vector<128x128xf32>
    %9 = arith.subf %5, %8 : vector<128x128xf32>
    %10 = math.exp %9 : vector<128x128xf32>
    %cst_6 = arith.constant dense<0.000000e+00> : vector<128xf32>
    %11 = vector.multi_reduction <add>, %10, %cst_6 [1] : vector<128x128xf32> to vector<128xf32>
    %12 = vector.shape_cast %11 : vector<128xf32> to vector<128x1xf32>
    %13 = math.log %12 : vector<128x1xf32>
    %14 = arith.addf %7, %13 : vector<128x1xf32>
    %15 = vector.broadcast %14 : vector<128x1xf32> to vector<128x128xf32>
    %16 = arith.subf %5, %15 : vector<128x128xf32>
    %c0_7 = arith.constant 0 : index
    %c0_8 = arith.constant 0 : index
    %17 = vector.load %arg4[%c0_7, %c0_8] : memref<128x128xf32, #tpu.memory_space<vmem>>, vector<128x128xf32>
    tpu.vector_store %arg4[%c0_7, %c0_8], %16 {strides = array<i32>} : memref<128x128xf32, #tpu.memory_space<vmem>>, vector<128x128xf32>,
    return
  }
  func.func @transform_0(%arg0: i32) -> (i32, i32) {
    %c0_i32 = arith.constant 0 : i32
    %c0_i32_0 = arith.constant 0 : i32
    return %arg0, %c0_i32 : i32, i32
  }
  func.func @transform_1(%arg0: i32) -> (i32, i32) {
    %c0_i32 = arith.constant 0 : i32
    %c0_i32_0 = arith.constant 0 : i32
    %c0_i32_1 = arith.constant 0 : i32
    return %c0_i32, %c0_i32_0 : i32, i32
  }
  func.func @transform_2(%arg0: i32) -> (i32, i32) {
    %c0_i32 = arith.constant 0 : i32
    %c0_i32_0 = arith.constant 0 : i32
    %c0_i32_1 = arith.constant 0 : i32
    return %c0_i32, %c0_i32_0 : i32, i32
  }
  func.func @transform_3(%arg0: i32) -> (i32, i32) {
    %c0_i32 = arith.constant 0 : i32
    %c0_i32_0 = arith.constant 0 : i32
    return %arg0, %c0_i32 : i32, i32
  }
}

module attributes {stable_mosaic.version = 11 : i64} {
  func.func @_lstm_step_kernel(%arg0: i32, %arg1: memref<1x16x128xf32, #tpu.memory_space<vmem>>, %arg2: memref<16x1xi32, #tpu.memory_space<vmem>>, %arg3: memref<128x512xf32, #tpu.memory_space<vmem>>, %arg4: memref<128x512xf32, #tpu.memory_space<vmem>>, %arg5: memref<1x512xf32, #tpu.memory_space<vmem>>, %arg6: memref<1x16x128xf32, #tpu.memory_space<vmem>>, %arg7: memref<16x128xf32, #tpu.memory_space<vmem>>, %arg8: memref<16x128xf32, #tpu.memory_space<vmem>>) attributes {dimension_semantics = [#tpu.dimension_semantics<arbitrary>], iteration_bounds = array<i64: 8>, scalar_prefetch = 0 : i64, scratch_operands = 2 : i64, tpu.core_type = #tpu.core_type<tc>, window_params = [{transform_indices = @transform_0, window_bounds = array<i64: 1, 16, 128>}, {pipeline_mode = #tpu.pipeline_mode<synchronous>, transform_indices = @transform_1, window_bounds = array<i64: 16, 1>}, {pipeline_mode = #tpu.pipeline_mode<synchronous>, transform_indices = @transform_2, window_bounds = array<i64: 128, 512>}, {pipeline_mode = #tpu.pipeline_mode<synchronous>, transform_indices = @transform_3, window_bounds = array<i64: 128, 512>}, {pipeline_mode = #tpu.pipeline_mode<synchronous>, transform_indices = @transform_4, window_bounds = array<i64: 1, 512>}, {transform_indices = @transform_5, window_bounds = array<i64: 1, 16, 128>}]} {
    %c0_i32 = arith.constant 0 : i32
    %0 = arith.cmpi eq, %arg0, %c0_i32 : i32
    %1 = arith.extui %0 : i1 to i32
    %c0_i32_0 = arith.constant 0 : i32
    %2 = arith.cmpi ne, %1, %c0_i32_0 : i32
    scf.if %2 {
      %cst_33 = arith.constant 0.000000e+00 : f32
      %58 = vector.broadcast %cst_33 : f32 to vector<16x128xf32>
      %c0_34 = arith.constant 0 : index
      %c0_35 = arith.constant 0 : index
      %59 = vector.load %arg7[%c0_34, %c0_35] : memref<16x128xf32, #tpu.memory_space<vmem>>, vector<16x128xf32>
      tpu.vector_store %arg7[%c0_34, %c0_35], %58 {strides = array<i32>} : memref<16x128xf32, #tpu.memory_space<vmem>>, vector<16x128xf32>,
      %cst_36 = arith.constant 0.000000e+00 : f32
      %60 = vector.broadcast %cst_36 : f32 to vector<16x128xf32>
      %c0_37 = arith.constant 0 : index
      %c0_38 = arith.constant 0 : index
      %61 = vector.load %arg8[%c0_37, %c0_38] : memref<16x128xf32, #tpu.memory_space<vmem>>, vector<16x128xf32>
      tpu.vector_store %arg8[%c0_37, %c0_38], %60 {strides = array<i32>} : memref<16x128xf32, #tpu.memory_space<vmem>>, vector<16x128xf32>,
    } else {
    }
    %c0 = arith.constant 0 : index
    %c0_1 = arith.constant 0 : index
    %c0_2 = arith.constant 0 : index
    %3 = vector.load %arg1[%c0, %c0_1, %c0_2] : memref<1x16x128xf32, #tpu.memory_space<vmem>>, vector<1x16x128xf32>
    %4 = vector.shape_cast %3 : vector<1x16x128xf32> to vector<16x128xf32>
    %c0_3 = arith.constant 0 : index
    %c0_4 = arith.constant 0 : index
    %5 = vector.load %arg7[%c0_3, %c0_4] : memref<16x128xf32, #tpu.memory_space<vmem>>, vector<16x128xf32>
    %c0_5 = arith.constant 0 : index
    %c0_6 = arith.constant 0 : index
    %6 = vector.load %arg3[%c0_5, %c0_6] : memref<128x512xf32, #tpu.memory_space<vmem>>, vector<128x512xf32>
    %cst = arith.constant dense<0.000000e+00> : vector<16x512xf32>
    %7 = tpu.matmul %4, %6, %cst {dimension_numbers = #tpu.dot_dimension_numbers<[1], [0], [0], [1], [0, 0, 1, 1], [], []>} : vector<16x128xf32>, vector<128x512xf32>, vector<16x512xf32> -> vector<16x512xf32>
    %c0_7 = arith.constant 0 : index
    %c0_8 = arith.constant 0 : index
    %8 = vector.load %arg4[%c0_7, %c0_8] : memref<128x512xf32, #tpu.memory_space<vmem>>, vector<128x512xf32>
    %cst_9 = arith.constant dense<0.000000e+00> : vector<16x512xf32>
    %9 = tpu.matmul %5, %8, %cst_9 {dimension_numbers = #tpu.dot_dimension_numbers<[1], [0], [0], [1], [0, 0, 1, 1], [], []>} : vector<16x128xf32>, vector<128x512xf32>, vector<16x512xf32> -> vector<16x512xf32>
    %10 = arith.addf %7, %9 : vector<16x512xf32>
    %c0_10 = arith.constant 0 : index
    %c0_11 = arith.constant 0 : index
    %11 = vector.load %arg5[%c0_10, %c0_11] : memref<1x512xf32, #tpu.memory_space<vmem>>, vector<1x512xf32>
    %12 = vector.broadcast %11 : vector<1x512xf32> to vector<16x512xf32>
    %13 = arith.addf %10, %12 : vector<16x512xf32>
    %14 = vector.extract_strided_slice %13 {offsets = [0, 0], sizes = [16, 128], strides = [1, 1]} : vector<16x512xf32> to vector<16x128xf32>
    %cst_12 = arith.constant 0.000000e+00 : f32
    %15 = vector.broadcast %cst_12 : f32 to vector<16x128xf32>
    %16 = arith.subf %15, %14 : vector<16x128xf32>
    %17 = math.exp %16 : vector<16x128xf32>
    %cst_13 = arith.constant 1.000000e+00 : f32
    %18 = vector.broadcast %cst_13 : f32 to vector<16x128xf32>
    %19 = arith.addf %18, %17 : vector<16x128xf32>
    %cst_14 = arith.constant 1.000000e+00 : f32
    %20 = vector.broadcast %cst_14 : f32 to vector<16x128xf32>
    %21 = arith.divf %20, %19 : vector<16x128xf32>
    %22 = vector.extract_strided_slice %13 {offsets = [0, 128], sizes = [16, 128], strides = [1, 1]} : vector<16x512xf32> to vector<16x128xf32>
    %cst_15 = arith.constant 0.000000e+00 : f32
    %23 = vector.broadcast %cst_15 : f32 to vector<16x128xf32>
    %24 = arith.subf %23, %22 : vector<16x128xf32>
    %25 = math.exp %24 : vector<16x128xf32>
    %cst_16 = arith.constant 1.000000e+00 : f32
    %26 = vector.broadcast %cst_16 : f32 to vector<16x128xf32>
    %27 = arith.addf %26, %25 : vector<16x128xf32>
    %cst_17 = arith.constant 1.000000e+00 : f32
    %28 = vector.broadcast %cst_17 : f32 to vector<16x128xf32>
    %29 = arith.divf %28, %27 : vector<16x128xf32>
    %30 = vector.extract_strided_slice %13 {offsets = [0, 256], sizes = [16, 128], strides = [1, 1]} : vector<16x512xf32> to vector<16x128xf32>
    %31 = math.tanh %30 : vector<16x128xf32>
    %32 = vector.extract_strided_slice %13 {offsets = [0, 384], sizes = [16, 128], strides = [1, 1]} : vector<16x512xf32> to vector<16x128xf32>
    %cst_18 = arith.constant 0.000000e+00 : f32
    %33 = vector.broadcast %cst_18 : f32 to vector<16x128xf32>
    %34 = arith.subf %33, %32 : vector<16x128xf32>
    %35 = math.exp %34 : vector<16x128xf32>
    %cst_19 = arith.constant 1.000000e+00 : f32
    %36 = vector.broadcast %cst_19 : f32 to vector<16x128xf32>
    %37 = arith.addf %36, %35 : vector<16x128xf32>
    %cst_20 = arith.constant 1.000000e+00 : f32
    %38 = vector.broadcast %cst_20 : f32 to vector<16x128xf32>
    %39 = arith.divf %38, %37 : vector<16x128xf32>
    %c0_21 = arith.constant 0 : index
    %c0_22 = arith.constant 0 : index
    %40 = vector.load %arg8[%c0_21, %c0_22] : memref<16x128xf32, #tpu.memory_space<vmem>>, vector<16x128xf32>
    %41 = arith.mulf %29, %40 : vector<16x128xf32>
    %42 = arith.mulf %21, %31 : vector<16x128xf32>
    %43 = arith.addf %41, %42 : vector<16x128xf32>
    %44 = math.tanh %43 : vector<16x128xf32>
    %45 = arith.mulf %39, %44 : vector<16x128xf32>
    %c0_23 = arith.constant 0 : index
    %c0_24 = arith.constant 0 : index
    %46 = vector.load %arg7[%c0_23, %c0_24] : memref<16x128xf32, #tpu.memory_space<vmem>>, vector<16x128xf32>
    tpu.vector_store %arg7[%c0_23, %c0_24], %45 {strides = array<i32>} : memref<16x128xf32, #tpu.memory_space<vmem>>, vector<16x128xf32>,
    %c0_25 = arith.constant 0 : index
    %c0_26 = arith.constant 0 : index
    %47 = vector.load %arg8[%c0_25, %c0_26] : memref<16x128xf32, #tpu.memory_space<vmem>>, vector<16x128xf32>
    tpu.vector_store %arg8[%c0_25, %c0_26], %43 {strides = array<i32>} : memref<16x128xf32, #tpu.memory_space<vmem>>, vector<16x128xf32>,
    %c0_27 = arith.constant 0 : index
    %c0_28 = arith.constant 0 : index
    %48 = vector.load %arg2[%c0_27, %c0_28] : memref<16x1xi32, #tpu.memory_space<vmem>>, vector<16x1xi32>
    %49 = vector.broadcast %arg0 : i32 to vector<16x1xi32>
    %50 = arith.cmpi sgt, %48, %49 : vector<16x1xi32>
    %cst_29 = arith.constant 0.000000e+00 : f32
    %51 = vector.shape_cast %50 : vector<16x1xi1> to vector<16x1xi1>
    %52 = vector.broadcast %51 : vector<16x1xi1> to vector<16x128xi1>
    %53 = vector.broadcast %cst_29 : f32 to vector<16x128xf32>
    %54 = arith.select %52, %45, %53 : vector<16x128xi1>, vector<16x128xf32>
    %c0_30 = arith.constant 0 : index
    %c0_31 = arith.constant 0 : index
    %c0_32 = arith.constant 0 : index
    %55 = vector.load %arg6[%c0_30, %c0_31, %c0_32] : memref<1x16x128xf32, #tpu.memory_space<vmem>>, vector<1x16x128xf32>
    %56 = vector.shape_cast %55 : vector<1x16x128xf32> to vector<16x128xf32>
    %57 = vector.shape_cast %54 : vector<16x128xf32> to vector<1x16x128xf32>
    tpu.vector_store %arg6[%c0_30, %c0_31, %c0_32], %57 {strides = array<i32>} : memref<1x16x128xf32, #tpu.memory_space<vmem>>, vector<1x16x128xf32>,
    return
  }
  func.func @transform_0(%arg0: i32) -> (i32, i32, i32) {
    %c0_i32 = arith.constant 0 : i32
    %c0_i32_0 = arith.constant 0 : i32
    %c0_i32_1 = arith.constant 0 : i32
    return %arg0, %c0_i32, %c0_i32_0 : i32, i32, i32
  }
  func.func @transform_1(%arg0: i32) -> (i32, i32) {
    %c0_i32 = arith.constant 0 : i32
    %c0_i32_0 = arith.constant 0 : i32
    %c0_i32_1 = arith.constant 0 : i32
    return %c0_i32, %c0_i32_0 : i32, i32
  }
  func.func @transform_2(%arg0: i32) -> (i32, i32) {
    %c0_i32 = arith.constant 0 : i32
    %c0_i32_0 = arith.constant 0 : i32
    %c0_i32_1 = arith.constant 0 : i32
    return %c0_i32, %c0_i32_0 : i32, i32
  }
  func.func @transform_3(%arg0: i32) -> (i32, i32) {
    %c0_i32 = arith.constant 0 : i32
    %c0_i32_0 = arith.constant 0 : i32
    %c0_i32_1 = arith.constant 0 : i32
    return %c0_i32, %c0_i32_0 : i32, i32
  }
  func.func @transform_4(%arg0: i32) -> (i32, i32) {
    %c0_i32 = arith.constant 0 : i32
    %c0_i32_0 = arith.constant 0 : i32
    %c0_i32_1 = arith.constant 0 : i32
    return %c0_i32, %c0_i32_0 : i32, i32
  }
  func.func @transform_5(%arg0: i32) -> (i32, i32, i32) {
    %c0_i32 = arith.constant 0 : i32
    %c0_i32_0 = arith.constant 0 : i32
    %c0_i32_1 = arith.constant 0 : i32
    return %arg0, %c0_i32, %c0_i32_0 : i32, i32, i32
  }
}

</mosaic_0001>

<bundles_post_ra>
// kernel: rnn_tagger_forward.3
= control target key start
LH: loop header
LB: loop body
LE: loop exit
PB: predicated region body
PF: predicated region fallthrough
CT: control target
= control target key end

     0   :  { %s906_s1 = inlined_call_operand.vmem [shape: f32[128,128], index: 1, kind: input, shape index: {}]   ;;  %s907_s0 = inlined_call_operand.vmem [shape: f32[128,128], index: 0, kind: input, shape index: {}]   ;;  %s908_s2 = inlined_call_operand.vmem [shape: f32[1,128], index: 2, kind: input, shape index: {}]   ;;  %s909_s3 = inlined_call_operand.vmem [shape: f32[128,128], index: 3, kind: output, shape index: {}]  }
   0x1   :  { %v30_v0 = vld [vmem:[%s906_s1] sm:$0xff]  ;;  %v31_v1 = vld [vmem:[%s906_s1 + $0x8] sm:$0xff]  ;;  %v32_v2 = vld [vmem:[%s906_s1 + $0x10] sm:$0xff] }
   0x2   :  { %v483_v3 = vpack.c.bf16 %v31_v1, %v30_v0  ;;  %v33_v4 = vld [vmem:[%s906_s1 + $0x18] sm:$0xff]  ;;  %v34_v6 = vld [vmem:[%s906_s1 + $0x20] sm:$0xff]  ;;  %v35_v7 = vld [vmem:[%s906_s1 + $0x28] sm:$0xff] }
   0x3   :  { %v487_v5 = vpack.c.bf16 %v33_v4, %v32_v2  ;;  %v491_v8 = vpack.c.bf16 %v35_v7, %v34_v6  ;;  %v14_v9 = vld [vmem:[%s907_s0] sm:$0xff]  ;;  %v36_v11 = vld [vmem:[%s906_s1 + $0x30] sm:$0xff]  ;;  %v37_v12 = vld [vmem:[%s906_s1 + $0x38] sm:$0xff] }
   0x4   :  { %484 = vmatprep.subr.bf16.mxu0 %v483_v3  ;;  %515 = vmatprep.subr.bf16.mxu1 %v483_v3  ;;  %v22_v10 = vld [vmem:[%s907_s0 + $0x40] sm:$0xff]  ;;  %v495_v13 = vpack.c.bf16 %v37_v12, %v36_v11  ;;  %v39_v15 = vld [vmem:[%s906_s1 + $0x48] sm:$0xff]  ;;  %v40_v17 = vld [vmem:[%s906_s1 + $0x50] sm:$0xff] }
   0x5   :  { %486 = vmatpush3.bf16.msra.mxu0 %v483_v3  ;;  %523 = vmatpush3.bf16.msra.mxu1 %v483_v3  ;;  %v38_v14 = vld [vmem:[%s906_s1 + $0x40] sm:$0xff]  ;;  %v41_v18 = vld [vmem:[%s906_s1 + $0x58] sm:$0xff]  ;;  %v43_v21 = vld [vmem:[%s906_s1 + $0x68] sm:$0xff] }
   0x6   :  { %488 = vmatprep.subr.bf16.mxu0 %v487_v5  ;;  %516 = vmatprep.subr.bf16.mxu1 %v487_v5  ;;  %v499_v16 = vpack.c.bf16 %v39_v15, %v38_v14  ;;  %v503_v19 = vpack.c.bf16 %v41_v18, %v40_v17  ;;  %v42_v20 = vld [vmem:[%s906_s1 + $0x60] sm:$0xff]  ;;  %v44_v23 = vld [vmem:[%s906_s1 + $0x70] sm:$0xff]  ;;  %v45_v24 = vld [vmem:[%s906_s1 + $0x78] sm:$0xff] }
   0x7   :  { %459 = vmatprep.mubr.f32.mxu0 %v14_v9  ;;  %471 = vmatprep.mubr.f32.mxu1 %v22_v10  ;;  %v507_v22 = vpack.c.bf16 %v43_v21, %v42_v20  ;;  %v511_v25 = vpack.c.bf16 %v45_v24, %v44_v23  ;;  %v15_v26 = vld [vmem:[%s907_s0 + $0x8] sm:$0xff]  ;;  %v16_v28 = vld [vmem:[%s907_s0 + $0x10] sm:$0xff]  ;;  %v17_v30 = vld [vmem:[%s907_s0 + $0x18] sm:$0xff] }
   0x8   :  { %v23_v27 = vld [vmem:[%s907_s0 + $0x48] sm:$0xff]  ;;  %v24_v29 = vld [vmem:[%s907_s0 + $0x50] sm:$0xff]  ;;  %v25_v31 = vld [vmem:[%s907_s0 + $0x58] sm:$0xff] }
   0x9   :  { %490 = vmatpush3.bf16.msra.mxu0 %v487_v5  ;;  %524 = vmatpush3.bf16.msra.mxu1 %v487_v5  ;;  %v18_v32 = vld [vmem:[%s907_s0 + $0x20] sm:$0xff]  ;;  %v19_v34 = vld [vmem:[%s907_s0 + $0x28] sm:$0xff]  ;;  %v20_v36 = vld [vmem:[%s907_s0 + $0x30] sm:$0xff] }
   0xa   :  { %492 = vmatprep.subr.bf16.mxu0 %v491_v8  ;;  %517 = vmatprep.subr.bf16.mxu1 %v491_v8  ;;  %v26_v33 = vld [vmem:[%s907_s0 + $0x60] sm:$0xff]  ;;  %v27_v35 = vld [vmem:[%s907_s0 + $0x68] sm:$0xff]  ;;  %v28_v37 = vld [vmem:[%s907_s0 + $0x70] sm:$0xff] }
   0xb   :  { %v21_v38 = vld [vmem:[%s907_s0 + $0x38] sm:$0xff]  ;;  %v394_v40 = vld [vmem:[%s908_s2] ss:$0 sm:$0xff] }
   0xc   :  { %v29_v39 = vld [vmem:[%s907_s0 + $0x78] sm:$0xff] }
   0xd   :  { %494 = vmatpush3.bf16.msra.mxu0 %v491_v8  ;;  %525 = vmatpush3.bf16.msra.mxu1 %v491_v8 }
   0xe   :  { %496 = vmatprep.subr.bf16.mxu0 %v495_v13  ;;  %518 = vmatprep.subr.bf16.mxu1 %v495_v13 }
  0x11   :  { %498 = vmatpush3.bf16.msra.mxu0 %v495_v13  ;;  %526 = vmatpush3.bf16.msra.mxu1 %v495_v13 }
  0x12   :  { %500 = vmatprep.subr.bf16.mxu0 %v499_v16  ;;  %519 = vmatprep.subr.bf16.mxu1 %v499_v16 }
  0x15   :  { %502 = vmatpush3.bf16.msra.mxu0 %v499_v16  ;;  %527 = vmatpush3.bf16.msra.mxu1 %v499_v16 }
  0x16   :  { %504 = vmatprep.subr.bf16.mxu0 %v503_v19  ;;  %520 = vmatprep.subr.bf16.mxu1 %v503_v19 }
  0x19   :  { %506 = vmatpush3.bf16.msra.mxu0 %v503_v19  ;;  %528 = vmatpush3.bf16.msra.mxu1 %v503_v19 }
  0x1a   :  { %508 = vmatprep.subr.bf16.mxu0 %v507_v22  ;;  %521 = vmatprep.subr.bf16.mxu1 %v507_v22 }
  0x1d   :  { %510 = vmatpush3.bf16.msra.mxu0 %v507_v22  ;;  %529 = vmatpush3.bf16.msra.mxu1 %v507_v22 }
  0x1e   :  { %512 = vmatprep.subr.bf16.mxu0 %v511_v25  ;;  %522 = vmatprep.subr.bf16.mxu1 %v511_v25 }
  0x21   :  { %514 = vmatpush3.bf16.msra.mxu0 %v511_v25  ;;  %530 = vmatpush3.bf16.msra.mxu1 %v511_v25 }
  0x24   :  { %460 = vmatmul.mubr.f32.vlgmr.msra.gmra.mrb[0].mxu0 %v15_v26  ;;  %472 = vmatmul.mubr.f32.vlgmr.msra.gmra.mrb[0].mxu1 %v23_v27 }
  0x25   :  { %462 = vmatprep.mubr.f32.mxu0 %v16_v28  ;;  %474 = vmatprep.mubr.f32.mxu1 %v24_v29 }
  0x28   :  { %463 = vmatmul.mubr.f32.gmra.mrb[2].mxu0 %v17_v30  ;;  %475 = vmatmul.mubr.f32.gmra.mrb[2].mxu1 %v25_v31 }
  0x29   :  { %465 = vmatprep.mubr.f32.mxu0 %v18_v32  ;;  %477 = vmatprep.mubr.f32.mxu1 %v26_v33 }
  0x2c   :  { %466 = vmatmul.mubr.f32.gmra.mrb[4].mxu0 %v19_v34  ;;  %478 = vmatmul.mubr.f32.gmra.mrb[4].mxu1 %v27_v35 }
  0x2d   :  { %468 = vmatprep.mubr.f32.mxu0 %v20_v36  ;;  %480 = vmatprep.mubr.f32.mxu1 %v28_v37 }
  0x30   :  { %469 = vmatmul.mubr.f32.gmra.mrb[6].mxu0 %v21_v38  ;;  %481 = vmatmul.mubr.f32.gmra.mrb[6].mxu1 %v29_v39 }
  0xf7   :  { %v461_v41 = vpop.f32.mrb[0].mxu0  ;;  %v473_v42 = vpop.f32.mrb[0].mxu1 }
  0xf8   :  { %v714_v43 = vadd.f32 %v461_v41, %v394_v40  ;;  %v716_v44 = vadd.f32 %v473_v42, %v394_v40  ;;  %v119_v45 = vpop.f32.mrb[1].mxu0  ;;  %v159_v46 = vpop.f32.mrb[1].mxu1 }
  0xf9   :  { %v720_v49 = vadd.f32 %v394_v40, %v119_v45  ;;  %v728_v56 = vadd.f32 %v394_v40, %v159_v46 }
  0xfa   :  { %216 = vmax.xlane.f32.xlu1 %v716_v44  ;;  %200 = vmax.xlane.f32.xlu0 %v714_v43 }
  0xfb   :  { %v464_v47 = vpop.f32.mrb[2].mxu0  ;;  %v476_v48 = vpop.f32.mrb[2].mxu1 }
  0xfc   :  { %v722_v50 = vadd.f32 %v464_v47, %v394_v40  ;;  %v129_v51 = vpop.f32.mrb[3].mxu0  ;;  %v169_v52 = vpop.f32.mrb[3].mxu1  ;;  %v724_v53 = vadd.f32 %v476_v48, %v394_v40 }
  0xfd   :  { %v732_v61 = vadd.f32 %v394_v40, %v129_v51  ;;  %v734_v62 = vadd.f32 %v394_v40, %v169_v52 }
  0xfe   :  { %204 = vmax.xlane.f32.xlu1 %v722_v50  ;;  %198 = vmax.xlane.f32.xlu0 %v720_v49 }
  0xff   :  { %v467_v54 = vpop.f32.mrb[4].mxu0  ;;  %v479_v55 = vpop.f32.mrb[4].mxu1 }
 0x100   :  { %v139_v57 = vpop.f32.mrb[5].mxu0  ;;  %v179_v58 = vpop.f32.mrb[5].mxu1  ;;  %v736_v1 = vadd.f32 %v467_v54, %v394_v40  ;;  %v742_v3 = vadd.f32 %v479_v55, %v394_v40 }
 0x101   :  { %v740_v2 = vadd.f32 %v394_v40, %v139_v57  ;;  %v746_v4 = vadd.f32 %v394_v40, %v179_v58 }
 0x102   :  { %220 = vmax.xlane.f32.xlu1 %v724_v53  ;;  %214 = vmax.xlane.f32.xlu0 %v728_v56 }
 0x103   :  { %v470_v59 = vpop.f32.mrb[6].mxu0  ;;  %v482_v60 = vpop.f32.mrb[6].mxu1 }
 0x104   :  { %v149_v63 = vpop.f32.mrb[7].mxu0  ;;  %v189_v0 = vpop.f32.mrb[7].mxu1  ;;  %v748_v5 = vadd.f32 %v470_v59, %v394_v40  ;;  %v754_v7 = vadd.f32 %v482_v60, %v394_v40 }
 0x105   :  { %v752_v6 = vadd.f32 %v394_v40, %v149_v63  ;;  %v758_v8 = vadd.f32 %v394_v40, %v189_v0 }
 0x106   :  { %202 = vmax.xlane.f32.xlu1 %v732_v61  ;;  %218 = vmax.xlane.f32.xlu0 %v734_v62 }
 0x10a   :  { %208 = vmax.xlane.f32.xlu1 %v736_v1  ;;  %206 = vmax.xlane.f32.xlu0 %v740_v2 }
 0x10e   :  { %224 = vmax.xlane.f32.xlu1 %v742_v3  ;;  %222 = vmax.xlane.f32.xlu0 %v746_v4 }
 0x112   :  { %212 = vmax.xlane.f32.xlu1 %v748_v5  ;;  %210 = vmax.xlane.f32.xlu0 %v752_v6 }
 0x116   :  { %228 = vmax.xlane.f32.xlu1 %v754_v7  ;;  %226 = vmax.xlane.f32.xlu0 %v758_v8 }
 0x187   :  { %v762_v9 = vpop.xlane.xlu1 %216  ;;  %v764_v10 = vpop.xlane.xlu0 %200 }
 0x188   :  { %v239_v11 = vsub.f32 %v716_v44, %v762_v9  ;;  %v231_v12 = vsub.f32 %v714_v43, %v764_v10 }
 0x18a   :  { %v248_v13 = vmul.f32 1.442695, %v231_v12  ;;  %v264_v16 = vmul.f32 1.442695, %v239_v11 }
 0x18b   :  { %v770_v14 = vpop.xlane.xlu1 %204  ;;  %v772_v15 = vpop.xlane.xlu0 %198 }
 0x18c   :  { %v233_v17 = vsub.f32 %v722_v50, %v770_v14  ;;  %v230_v18 = vsub.f32 %v720_v49, %v772_v15  ;;  %531 = vpow2.f32 %v248_v13 }
 0x18d   :  { %533 = vpow2.f32 %v264_v16 }
 0x18e   :  { %v246_v19 = vmul.f32 1.442695, %v230_v18  ;;  %v252_v22 = vmul.f32 1.442695, %v233_v17 }
 0x18f   :  { %v778_v20 = vpop.xlane.xlu1 %220  ;;  %v780_v21 = vpop.xlane.xlu0 %214 }
 0x190   :  { %v238_v23 = vsub.f32 %v728_v56, %v780_v21  ;;  %535 = vpow2.f32 %v246_v19  ;;  %v241_v24 = vsub.f32 %v724_v53, %v778_v20 }
 0x191   :  { %537 = vpow2.f32 %v252_v22 }
 0x192   :  { %v262_v25 = vmul.f32 1.442695, %v238_v23  ;;  %v268_v29 = vmul.f32 1.442695, %v241_v24 }
 0x193   :  { %v786_v26 = vpop.xlane.xlu1 %202  ;;  %v788_v27 = vpop.xlane.xlu0 %218 }
 0x194   :  { %v232_v28 = vsub.f32 %v732_v61, %v786_v26  ;;  %539 = vpow2.f32 %v262_v25  ;;  %v240_v30 = vsub.f32 %v734_v62, %v788_v27 }
 0x196   :  { %v250_v31 = vmul.f32 1.442695, %v232_v28  ;;  %v532_v32 = vpop.eup %531  ;;  %v266_v36 = vmul.f32 1.442695, %v240_v30 }
 0x197   :  { %v794_v33 = vpop.xlane.xlu1 %208  ;;  %v796_v34 = vpop.xlane.xlu0 %206  ;;  %280 = vadd.xlane.f32.xlu1 %v532_v32 }
 0x198   :  { %541 = vpow2.f32 %v250_v31  ;;  %v235_v35 = vsub.f32 %v736_v1, %v794_v33  ;;  %v234_v37 = vsub.f32 %v740_v2, %v796_v34  ;;  %v534_v38 = vpop.eup %533 }
 0x199   :  { %543 = vpow2.f32 %v268_v29 }
 0x19a   :  { %v256_v39 = vmul.f32 1.442695, %v235_v35  ;;  %v536_v40 = vpop.eup %535  ;;  %v254_v46 = vmul.f32 1.442695, %v234_v37 }
 0x19b   :  { %v802_v41 = vpop.xlane.xlu1 %224  ;;  %v804_v42 = vpop.xlane.xlu0 %222  ;;  %296 = vadd.xlane.f32.xlu1 %v534_v38  ;;  %278 = vadd.xlane.f32.xlu0 %v536_v40 }
 0x19c   :  { %545 = vpow2.f32 %v256_v39  ;;  %v243_v45 = vsub.f32 %v742_v3, %v802_v41  ;;  %v242_v47 = vsub.f32 %v746_v4, %v804_v42  ;;  %v538_v48 = vpop.eup %537 }
 0x19d   :  { %547 = vpow2.f32 %v266_v36 }
 0x19e   :  { %v272_v51 = vmul.f32 1.442695, %v243_v45  ;;  %v540_v52 = vpop.eup %539  ;;  %v270_v58 = vmul.f32 1.442695, %v242_v47 }
 0x19f   :  { %v810_v54 = vpop.xlane.xlu1 %212  ;;  %v812_v55 = vpop.xlane.xlu0 %210  ;;  %284 = vadd.xlane.f32.xlu1 %v538_v48  ;;  %294 = vadd.xlane.f32.xlu0 %v540_v52 }
 0x1a0   :  { %549 = vpow2.f32 %v272_v51  ;;  %v237_v57 = vsub.f32 %v748_v5, %v810_v54  ;;  %v236_v59 = vsub.f32 %v752_v6, %v812_v55 }
 0x1a1   :  { %551 = vpow2.f32 %v254_v46 }
 0x1a2   :  { %v542_v60 = vpop.eup %541  ;;  %v260_v63 = vmul.f32 1.442695, %v237_v57  ;;  %v258_v16 = vmul.f32 1.442695, %v236_v59 }
 0x1a3   :  { %v544_v0 = vpop.eup %543  ;;  %v818_v11 = vpop.xlane.xlu1 %228  ;;  %282 = vadd.xlane.f32.xlu0 %v542_v60 }
 0x1a4   :  { %v820_v12 = vpop.xlane.xlu0 %226  ;;  %553 = vpow2.f32 %v260_v63  ;;  %300 = vadd.xlane.f32.xlu1 %v544_v0  ;;  %v245_v13 = vsub.f32 %v754_v7, %v818_v11 }
 0x1a5   :  { %555 = vpow2.f32 %v270_v58  ;;  %v244_v17 = vsub.f32 %v758_v8, %v820_v12 }
 0x1a6   :  { %v546_v18 = vpop.eup %545  ;;  %v276_v19 = vmul.f32 1.442695, %v245_v13 }
 0x1a7   :  { %v548_v22 = vpop.eup %547  ;;  %v274_v23 = vmul.f32 1.442695, %v244_v17 }
 0x1a8   :  { %557 = vpow2.f32 %v276_v19  ;;  %288 = vadd.xlane.f32.xlu1 %v546_v18  ;;  %298 = vadd.xlane.f32.xlu0 %v548_v22 }
 0x1a9   :  { %559 = vpow2.f32 %v258_v16 }
 0x1aa   :  { %v550_v24 = vpop.eup %549  ;;  %561 = vpow2.f32 %v274_v23 }
 0x1ab   :  { %v552_v25 = vpop.eup %551 }
 0x1ac   :  { %304 = vadd.xlane.f32.xlu1 %v550_v24  ;;  %286 = vadd.xlane.f32.xlu0 %v552_v25 }
 0x1ae   :  { %v554_v28 = vpop.eup %553 }
 0x1af   :  { %v556_v29 = vpop.eup %555 }
 0x1b0   :  { %292 = vadd.xlane.f32.xlu1 %v554_v28  ;;  %302 = vadd.xlane.f32.xlu0 %v556_v29 }
 0x1b2   :  { %v558_v30 = vpop.eup %557 }
 0x1b3   :  { %v560_v31 = vpop.eup %559 }
 0x1b4   :  { %308 = vadd.xlane.f32.xlu1 %v558_v30  ;;  %290 = vadd.xlane.f32.xlu0 %v560_v31  ;;  %v562_v32 = vpop.eup %561 }
 0x1b8   :  { %306 = vadd.xlane.f32.xlu0 %v562_v32 }
 0x224   :  { %v281_v35 = vpop.xlane.xlu1 %280 }
 0x225   :  { %563 = vlog2.f32 %v281_v35 }
 0x228   :  { %v297_v36 = vpop.xlane.xlu1 %296  ;;  %v279_v37 = vpop.xlane.xlu0 %278 }
 0x229   :  { %565 = vlog2.f32 %v297_v36 }
 0x22a   :  { %567 = vlog2.f32 %v279_v37 }
 0x22c   :  { %v285_v38 = vpop.xlane.xlu1 %284  ;;  %v295_v39 = vpop.xlane.xlu0 %294 }
 0x22d   :  { %569 = vlog2.f32 %v285_v38 }
 0x22e   :  { %571 = vlog2.f32 %v295_v39 }
 0x22f   :  { %v564_v40 = vpop.eup %563 }
 0x230   :  { %v313_v45 = vmul.f32 0.6931472, %v564_v40  ;;  %v283_v47 = vpop.xlane.xlu0 %282 }
 0x231   :  { %v301_v46 = vpop.xlane.xlu1 %300 }
 0x232   :  { %573 = vlog2.f32 %v301_v46  ;;  %v343_v48 = vadd.f32 %v313_v45, %v764_v10 }
 0x233   :  { %575 = vlog2.f32 %v283_v47  ;;  %v566_v51 = vpop.eup %565 }
 0x234   :  { %v568_v52 = vpop.eup %567  ;;  %v359_v57 = vsub.f32 %v714_v43, %v343_v48  ;;  %v329_v58 = vmul.f32 0.6931472, %v566_v51 }
 0x235   :  { %v289_v59 = vpop.xlane.xlu1 %288  ;;  %v299_v60 = vpop.xlane.xlu0 %298  ;;  %v311_v63 = vmul.f32 0.6931472, %v568_v52 }
 0x236   :  { %577 = vlog2.f32 %v289_v59  ;;  %375 = vst [vmem:[%s909_s3 + $0x8] sm:$0xff] %v359_v57  ;;  %v351_v0 = vadd.f32 %v329_v58, %v762_v9 }
 0x237   :  { %579 = vlog2.f32 %v299_v60  ;;  %v570_v13 = vpop.eup %569  ;;  %v342_v10 = vadd.f32 %v311_v63, %v772_v15 }
 0x238   :  { %v572_v16 = vpop.eup %571  ;;  %v367_v17 = vsub.f32 %v716_v44, %v351_v0  ;;  %v317_v18 = vmul.f32 0.6931472, %v570_v13 }
 0x239   :  { %v305_v43 = vpop.xlane.xlu1 %304  ;;  %v287_v19 = vpop.xlane.xlu0 %286  ;;  %v358_v22 = vsub.f32 %v720_v49, %v342_v10  ;;  %v327_v23 = vmul.f32 0.6931472, %v572_v16 }
 0x23a   :  { %581 = vlog2.f32 %v305_v43  ;;  %383 = vst [vmem:[%s909_s3 + $0x48] sm:$0xff] %v367_v17  ;;  %v345_v9 = vadd.f32 %v317_v18, %v770_v14 }
 0x23b   :  { %583 = vlog2.f32 %v287_v19  ;;  %374 = vst [vmem:[%s909_s3] sm:$0xff] %v358_v22  ;;  %v350_v44 = vadd.f32 %v327_v23, %v780_v21 }
 0x23c   :  { %v574_v24 = vpop.eup %573  ;;  %v361_v25 = vsub.f32 %v722_v50, %v345_v9 }
 0x23d   :  { %v576_v15 = vpop.eup %575  ;;  %v333_v49 = vmul.f32 0.6931472, %v574_v24  ;;  %v293_v28 = vpop.xlane.xlu1 %292  ;;  %v366_v30 = vsub.f32 %v728_v56, %v350_v44 }
 0x23e   :  { %v303_v29 = vpop.xlane.xlu0 %302  ;;  %v315_v31 = vmul.f32 0.6931472, %v576_v15  ;;  %585 = vlog2.f32 %v293_v28  ;;  %377 = vst [vmem:[%s909_s3 + $0x18] sm:$0xff] %v361_v25 }
 0x23f   :  { %v353_v14 = vadd.f32 %v333_v49, %v778_v20  ;;  %587 = vlog2.f32 %v303_v29  ;;  %382 = vst [vmem:[%s909_s3 + $0x40] sm:$0xff] %v366_v30 }
 0x240   :  { %v578_v32 = vpop.eup %577  ;;  %v344_v50 = vadd.f32 %v315_v31, %v786_v26 }
 0x241   :  { %v580_v21 = vpop.eup %579  ;;  %v369_v35 = vsub.f32 %v724_v53, %v353_v14  ;;  %v321_v56 = vmul.f32 0.6931472, %v578_v32  ;;  %v309_v36 = vpop.xlane.xlu1 %308 }
 0x242   :  { %v291_v37 = vpop.xlane.xlu0 %290  ;;  %v360_v38 = vsub.f32 %v732_v61, %v344_v50  ;;  %v331_v39 = vmul.f32 0.6931472, %v580_v21  ;;  %589 = vlog2.f32 %v309_v36 }
 0x243   :  { %385 = vst [vmem:[%s909_s3 + $0x58] sm:$0xff] %v369_v35  ;;  %v347_v20 = vadd.f32 %v321_v56, %v794_v33  ;;  %591 = vlog2.f32 %v291_v37 }
 0x244   :  { %v582_v40 = vpop.eup %581  ;;  %376 = vst [vmem:[%s909_s3 + $0x10] sm:$0xff] %v360_v38  ;;  %v352_v53 = vadd.f32 %v331_v39, %v788_v27 }
 0x245   :  { %v584_v26 = vpop.eup %583  ;;  %v363_v45 = vsub.f32 %v736_v1, %v347_v20  ;;  %v337_v61 = vmul.f32 0.6931472, %v582_v40 }
 0x246   :  { %v307_v46 = vpop.xlane.xlu0 %306  ;;  %v368_v47 = vsub.f32 %v734_v62, %v352_v53  ;;  %v319_v48 = vmul.f32 0.6931472, %v584_v26 }
 0x247   :  { %593 = vlog2.f32 %v307_v46  ;;  %379 = vst [vmem:[%s909_s3 + $0x28] sm:$0xff] %v363_v45  ;;  %v355_v33 = vadd.f32 %v337_v61, %v802_v41 }
 0x248   :  { %v586_v51 = vpop.eup %585  ;;  %384 = vst [vmem:[%s909_s3 + $0x50] sm:$0xff] %v368_v47  ;;  %v346_v27 = vadd.f32 %v319_v48, %v796_v34 }
 0x249   :  { %v588_v1 = vpop.eup %587  ;;  %v371_v52 = vsub.f32 %v742_v3, %v355_v33  ;;  %v325_v57 = vmul.f32 0.6931472, %v586_v51 }
 0x24a   :  { %v362_v62 = vsub.f32 %v740_v2, %v346_v27  ;;  %v335_v58 = vmul.f32 0.6931472, %v588_v1 }
 0x24b   :  { %387 = vst [vmem:[%s909_s3 + $0x68] sm:$0xff] %v371_v52  ;;  %v349_v41 = vadd.f32 %v325_v57, %v810_v54 }
 0x24c   :  { %v590_v59 = vpop.eup %589  ;;  %378 = vst [vmem:[%s909_s3 + $0x20] sm:$0xff] %v362_v62  ;;  %v354_v34 = vadd.f32 %v335_v58, %v804_v42 }
 0x24d   :  { %v592_v60 = vpop.eup %591  ;;  %v365_v3 = vsub.f32 %v748_v5, %v349_v41  ;;  %v341_v63 = vmul.f32 0.6931472, %v590_v59 }
 0x24e   :  { %v370_v2 = vsub.f32 %v746_v4, %v354_v34  ;;  %v323_v0 = vmul.f32 0.6931472, %v592_v60 }
 0x24f   :  { %381 = vst [vmem:[%s909_s3 + $0x38] sm:$0xff] %v365_v3  ;;  %v357_v54 = vadd.f32 %v341_v63, %v818_v11 }
 0x250   :  { %386 = vst [vmem:[%s909_s3 + $0x60] sm:$0xff] %v370_v2  ;;  %v348_v42 = vadd.f32 %v323_v0, %v812_v55 }
 0x251   :  { %v594_v13 = vpop.eup %593  ;;  %v373_v10 = vsub.f32 %v754_v7, %v357_v54 }
 0x252   :  { %v339_v5 = vmul.f32 0.6931472, %v594_v13  ;;  %v364_v16 = vsub.f32 %v752_v6, %v348_v42 }
 0x253   :  { %389 = vst [vmem:[%s909_s3 + $0x78] sm:$0xff] %v373_v10 }
 0x254   :  { %v356_v4 = vadd.f32 %v339_v5, %v820_v12  ;;  %380 = vst [vmem:[%s909_s3 + $0x30] sm:$0xff] %v364_v16 }
 0x256   :  { %v372_v11 = vsub.f32 %v758_v8, %v356_v4 }
 0x258   :  { %388 = vst [vmem:[%s909_s3 + $0x70] sm:$0xff] %v372_v11 }

// kernel: rnn_tagger_forward.2
= control target key start
LH: loop header
LB: loop body
LE: loop exit
PB: predicated region body
PF: predicated region fallthrough
CT: control target
= control target key end

     0   :  { %s1066_s18 = smov 0   ;;  %s1501_s0 = inlined_call_operand.vmem [shape: f32[8,16,128], index: 0, kind: input, shape index: {}]   ;;  %s1502_s1 = inlined_call_operand.vmem [shape: s32[16,1], index: 1, kind: input, shape index: {}]   ;;  %s1503_s2 = inlined_call_operand.vmem [shape: f32[128,512], index: 2, kind: input, shape index: {}]   ;;  %s1504_s3 = inlined_call_operand.vmem [shape: f32[128,512], index: 3, kind: input, shape index: {}]   ;;  %s1505_s4 = inlined_call_operand.vmem [shape: f32[1,512], index: 4, kind: input, shape index: {}]   ;;  %s1506_s5 = inlined_call_operand.vmem [shape: f32[8,16,128], index: 5, kind: output, shape index: {}]  }
   0x1 LB: > { %s1072_s19 = sadd.s32 4294967295, %s1031_s18   ;;  %p835_p0 = scmp.ge.s32.totalorder %s1031_s18, 1  ;;  %s1031_s18 = sphi %s1066_s18, %s15_s18  }
   0x2   : > { %p187_p1 = scmp.lt.s32.totalorder %s1031_s18, 9 }
   0x4   : > { %p188_p2 = pnand %p835_p0, %p187_p1 }
   0x5   : > { %p215_p3 = scmp.lt.s32.totalorder (!%p188_p2), %s1072_s19, 7  ;;  %p840_p4 = scmp.ne.s32.totalorder (!%p188_p2), %s1072_s19, 0 }
   0x6   : > { %191 = sbr.rel (%p188_p2) target bundleno = 355 (0x163), region = 40 }
   0xd   : > { %s216_s20 = scalar_select %p215_p3, %s1072_s19, 7 }
   0xe   : > { %228 = sbr.rel (%p840_p4) target bundleno = 21 (0x15), region = 44  ;;  %v1033_v0 = vmov (!%p840_p4), 0.0  }
   0xf   : > { %s843_s21 = sshll.u32 %s216_s20, 4  ;;  %229 = vst [vmem:[#allocation2] sm:$0xff] (!%p840_p4), %v1033_v0  ;;  %230 = vst [vmem:[#allocation2 + $0x8] sm:$0xff] (!%p840_p4), %v1033_v0 }
  0x10   : > { %s1081_s24 = scalar_lea.vmem %s1501_s0, %s843_s21  ;;  %s1086_s27 = scalar_lea.vmem %s1506_s5, %s843_s21  ;;  %231 = vst [vmem:[#allocation3] sm:$0xff] (!%p840_p4), %v1033_v0  ;;  %232 = vst [vmem:[#allocation3 + $0x8] sm:$0xff] (!%p840_p4), %v1033_v0 }
  0x15 PF: > { %v302_v1 = vld [vmem:[%s1504_s3 + $0x8] sm:$0xff]  ;;  %v304_v3 = vld [vmem:[%s1504_s3 + $0x18] sm:$0xff]  ;;  %v301_v6 = vld [vmem:[%s1504_s3] sm:$0xff]  ;;  %v1034_v8 = vmov 0.0   ;;  %v1035_v14 = vmov 0  }
  0x16   : > { %v306_v2 = vld [vmem:[%s1504_s3 + $0x28] sm:$0xff]  ;;  %v308_v5 = vld [vmem:[%s1504_s3 + $0x38] sm:$0xff]  ;;  %v305_v7 = vld [vmem:[%s1504_s3 + $0x20] sm:$0xff]  ;;  %429 = vmatprep.mubr.f32.mxu0 %v1034_v8  ;;  %506 = vmatprep.mubr.f32.mxu1 %v1034_v8 }
  0x17   : > { %v845_v4 = vpack.c.bf16 %v306_v2, %v302_v1  ;;  %v877_v9 = vpack.c.bf16 %v308_v5, %v304_v3  ;;  %v847_v10 = vpack.c.bf16 %v305_v7, %v301_v6  ;;  %v303_v11 = vld [vmem:[%s1504_s3 + $0x10] sm:$0xff]  ;;  %v310_v13 = vld [vmem:[%s1504_s3 + $0x48] sm:$0xff]  ;;  %992 = vset.pattern.permute.xlu0 %v1035_v14  ;;  %v312_v17 = vld [vmem:[%s1504_s3 + $0x58] sm:$0xff] }
  0x18   : > { %v307_v12 = vld [vmem:[%s1504_s3 + $0x30] sm:$0xff]  ;;  %v314_v16 = vld [vmem:[%s1504_s3 + $0x68] sm:$0xff]  ;;  %v316_v18 = vld [vmem:[%s1504_s3 + $0x78] sm:$0xff] }
  0x19   : > { %846 = vmatprep.subr.bf16.mxu0 %v845_v4  ;;  %v879_v15 = vpack.c.bf16 %v307_v12, %v303_v11  ;;  %878 = vmatprep.subr.bf16.mxu1 %v877_v9  ;;  %v849_v19 = vpack.c.bf16 %v314_v16, %v310_v13  ;;  %v881_v20 = vpack.c.bf16 %v316_v18, %v312_v17  ;;  %v309_v21 = vld [vmem:[%s1504_s3 + $0x40] sm:$0xff]  ;;  %v311_v23 = vld [vmem:[%s1504_s3 + $0x50] sm:$0xff]  ;;  %v318_v26 = vld [vmem:[%s1504_s3 + $0x88] sm:$0xff] }
  0x1a   : > { %848 = vmatpush1.bf16.msra.mxu0 %v847_v10  ;;  %v313_v22 = vld [vmem:[%s1504_s3 + $0x60] sm:$0xff]  ;;  %v315_v25 = vld [vmem:[%s1504_s3 + $0x70] sm:$0xff]  ;;  %v322_v27 = vld [vmem:[%s1504_s3 + $0xa8] sm:$0xff] }
  0x1b   : > { %880 = vmatpush1.bf16.msra.mxu1 %v879_v15  ;;  %v851_v24 = vpack.c.bf16 %v313_v22, %v309_v21  ;;  %850 = vmatprep.subr.bf16.mxu0 %v849_v19  ;;  %v883_v28 = vpack.c.bf16 %v315_v25, %v311_v23  ;;  %v853_v29 = vpack.c.bf16 %v322_v27, %v318_v26  ;;  %v320_v30 = vld [vmem:[%s1504_s3 + $0x98] sm:$0xff]  ;;  %v317_v32 = vld [vmem:[%s1504_s3 + $0x80] sm:$0xff]  ;;  %v319_v35 = vld [vmem:[%s1504_s3 + $0x90] sm:$0xff] }
  0x1c   : > { %882 = vmatprep.subr.bf16.mxu1 %v881_v20  ;;  %v324_v31 = vld [vmem:[%s1504_s3 + $0xb8] sm:$0xff]  ;;  %v321_v34 = vld [vmem:[%s1504_s3 + $0xa0] sm:$0xff]  ;;  %v323_v36 = vld [vmem:[%s1504_s3 + $0xb0] sm:$0xff] }
  0x1d   : > { %v885_v33 = vpack.c.bf16 %v324_v31, %v320_v30  ;;  %v855_v37 = vpack.c.bf16 %v321_v34, %v317_v32  ;;  %v326_v38 = vld [vmem:[%s1504_s3 + $0xc8] sm:$0xff]  ;;  %v328_v40 = vld [vmem:[%s1504_s3 + $0xd8] sm:$0xff]  ;;  %v887_v41 = vpack.c.bf16 %v323_v36, %v319_v35  ;;  %v325_v44 = vld [vmem:[%s1504_s3 + $0xc0] sm:$0xff] }
  0x1e   : > { %852 = vmatpush1.bf16.msra.mxu0 %v851_v24  ;;  %v330_v39 = vld [vmem:[%s1504_s3 + $0xe8] sm:$0xff]  ;;  %v332_v43 = vld [vmem:[%s1504_s3 + $0xf8] sm:$0xff]  ;;  %v329_v45 = vld [vmem:[%s1504_s3 + $0xe0] sm:$0xff] }
  0x1f   : > { %884 = vmatpush1.bf16.msra.mxu1 %v883_v28  ;;  %854 = vmatprep.subr.bf16.mxu0 %v853_v29  ;;  %v857_v42 = vpack.c.bf16 %v330_v39, %v326_v38  ;;  %v889_v46 = vpack.c.bf16 %v332_v43, %v328_v40  ;;  %v327_v47 = vld [vmem:[%s1504_s3 + $0xd0] sm:$0xff]  ;;  %v334_v49 = vld [vmem:[%s1504_s3 + $0x108] sm:$0xff]  ;;  %v336_v51 = vld [vmem:[%s1504_s3 + $0x118] sm:$0xff]  ;;  %v859_v53 = vpack.c.bf16 %v329_v45, %v325_v44 }
  0x20   : > { %886 = vmatprep.subr.bf16.mxu1 %v885_v33  ;;  %v331_v48 = vld [vmem:[%s1504_s3 + $0xf0] sm:$0xff]  ;;  %v338_v50 = vld [vmem:[%s1504_s3 + $0x128] sm:$0xff]  ;;  %v340_v52 = vld [vmem:[%s1504_s3 + $0x138] sm:$0xff] }
  0x21   : > { %v891_v54 = vpack.c.bf16 %v331_v48, %v327_v47  ;;  %v861_v55 = vpack.c.bf16 %v338_v50, %v334_v49  ;;  %v333_v56 = vld [vmem:[%s1504_s3 + $0x100] sm:$0xff]  ;;  %v335_v58 = vld [vmem:[%s1504_s3 + $0x110] sm:$0xff]  ;;  %v893_v59 = vpack.c.bf16 %v340_v52, %v336_v51  ;;  %v342_v61 = vld [vmem:[%s1504_s3 + $0x148] sm:$0xff] }
  0x22   : > { %856 = vmatpush1.bf16.msra.mxu0 %v855_v37  ;;  %v337_v57 = vld [vmem:[%s1504_s3 + $0x120] sm:$0xff]  ;;  %v339_v60 = vld [vmem:[%s1504_s3 + $0x130] sm:$0xff]  ;;  %v346_v62 = vld [vmem:[%s1504_s3 + $0x168] sm:$0xff] }
  0x23   : > { %888 = vmatpush1.bf16.msra.mxu1 %v887_v41  ;;  %858 = vmatprep.subr.bf16.mxu0 %v857_v42  ;;  %v344_v63 = vld [vmem:[%s1504_s3 + $0x158] sm:$0xff]  ;;  %v863_v1 = vpack.c.bf16 %v337_v57, %v333_v56  ;;  %v895_v2 = vpack.c.bf16 %v339_v60, %v335_v58  ;;  %v865_v3 = vpack.c.bf16 %v346_v62, %v342_v61  ;;  %v341_v4 = vld [vmem:[%s1504_s3 + $0x140] sm:$0xff]  ;;  %v343_v6 = vld [vmem:[%s1504_s3 + $0x150] sm:$0xff] }
  0x24   : > { %890 = vmatprep.subr.bf16.mxu1 %v889_v46  ;;  %v348_v0 = vld [vmem:[%s1504_s3 + $0x178] sm:$0xff]  ;;  %v345_v5 = vld [vmem:[%s1504_s3 + $0x160] sm:$0xff]  ;;  %v347_v9 = vld [vmem:[%s1504_s3 + $0x170] sm:$0xff] }
  0x25   : > { %v897_v7 = vpack.c.bf16 %v348_v0, %v344_v63  ;;  %v350_v10 = vld [vmem:[%s1504_s3 + $0x188] sm:$0xff]  ;;  %v352_v12 = vld [vmem:[%s1504_s3 + $0x198] sm:$0xff]  ;;  %v867_v15 = vpack.c.bf16 %v345_v5, %v341_v4  ;;  %v899_v16 = vpack.c.bf16 %v347_v9, %v343_v6  ;;  %v349_v18 = vld [vmem:[%s1504_s3 + $0x180] sm:$0xff] }
  0x26   : > { %860 = vmatpush1.bf16.msra.mxu0 %v859_v53  ;;  %v354_v11 = vld [vmem:[%s1504_s3 + $0x1a8] sm:$0xff]  ;;  %v356_v13 = vld [vmem:[%s1504_s3 + $0x1b8] sm:$0xff]  ;;  %v353_v19 = vld [vmem:[%s1504_s3 + $0x1a0] sm:$0xff] }
  0x27   : > { %892 = vmatpush1.bf16.msra.mxu1 %v891_v54  ;;  %862 = vmatprep.subr.bf16.mxu0 %v861_v55  ;;  %v869_v17 = vpack.c.bf16 %v354_v11, %v350_v10  ;;  %v351_v20 = vld [vmem:[%s1504_s3 + $0x190] sm:$0xff]  ;;  %v901_v21 = vpack.c.bf16 %v356_v13, %v352_v12  ;;  %v358_v23 = vld [vmem:[%s1504_s3 + $0x1c8] sm:$0xff]  ;;  %v360_v25 = vld [vmem:[%s1504_s3 + $0x1d8] sm:$0xff]  ;;  %v871_v27 = vpack.c.bf16 %v353_v19, %v349_v18 }
  0x28   : > { %894 = vmatprep.subr.bf16.mxu1 %v893_v59  ;;  %v355_v22 = vld [vmem:[%s1504_s3 + $0x1b0] sm:$0xff]  ;;  %v362_v24 = vld [vmem:[%s1504_s3 + $0x1e8] sm:$0xff]  ;;  %v364_v26 = vld [vmem:[%s1504_s3 + $0x1f8] sm:$0xff] }
  0x29   : > { %v903_v28 = vpack.c.bf16 %v355_v22, %v351_v20  ;;  %v873_v29 = vpack.c.bf16 %v362_v24, %v358_v23  ;;  %v357_v30 = vld [vmem:[%s1504_s3 + $0x1c0] sm:$0xff]  ;;  %v359_v32 = vld [vmem:[%s1504_s3 + $0x1d0] sm:$0xff]  ;;  %v905_v33 = vpack.c.bf16 %v364_v26, %v360_v25  ;;  %v238_v35 = vld [vmem:[%s1503_s2 + $0x8] sm:$0xff]  ;;  %v759_v25 = vstv %s1072_s19 }
  0x2a   : > { %864 = vmatpush1.bf16.msra.mxu0 %v863_v1  ;;  %v361_v31 = vld [vmem:[%s1504_s3 + $0x1e0] sm:$0xff]  ;;  %v363_v34 = vld [vmem:[%s1504_s3 + $0x1f0] sm:$0xff]  ;;  %v242_v36 = vld [vmem:[%s1503_s2 + $0x28] sm:$0xff] }
  0x2b   : > { %896 = vmatpush1.bf16.msra.mxu1 %v895_v2  ;;  %866 = vmatprep.subr.bf16.mxu0 %v865_v3  ;;  %v240_v37 = vld [vmem:[%s1503_s2 + $0x18] sm:$0xff]  ;;  %v875_v39 = vpack.c.bf16 %v361_v31, %v357_v30  ;;  %v907_v40 = vpack.c.bf16 %v363_v34, %v359_v32  ;;  %v909_v41 = vpack.c.bf16 %v242_v36, %v238_v35  ;;  %v237_v42 = vld [vmem:[%s1503_s2] sm:$0xff]  ;;  %v239_v44 = vld [vmem:[%s1503_s2 + $0x10] sm:$0xff] }
  0x2c   : > { %898 = vmatprep.subr.bf16.mxu1 %v897_v7  ;;  %v244_v38 = vld [vmem:[%s1503_s2 + $0x38] sm:$0xff]  ;;  %v241_v43 = vld [vmem:[%s1503_s2 + $0x20] sm:$0xff]  ;;  %v243_v46 = vld [vmem:[%s1503_s2 + $0x30] sm:$0xff] }
  0x2d   : > { %v941_v45 = vpack.c.bf16 %v244_v38, %v240_v37  ;;  %v246_v47 = vld [vmem:[%s1503_s2 + $0x48] sm:$0xff]  ;;  %v248_v49 = vld [vmem:[%s1503_s2 + $0x58] sm:$0xff]  ;;  %v235_v51 = vld [vmem:[#allocation2] sm:$0xff]  ;;  %v911_v52 = vpack.c.bf16 %v241_v43, %v237_v42  ;;  %v943_v53 = vpack.c.bf16 %v243_v46, %v239_v44 }
  0x2e   : > { %868 = vmatpush1.bf16.msra.mxu0 %v867_v15  ;;  %v250_v48 = vld [vmem:[%s1503_s2 + $0x68] sm:$0xff]  ;;  %v252_v50 = vld [vmem:[%s1503_s2 + $0x78] sm:$0xff]  ;;  %v245_v55 = vld [vmem:[%s1503_s2 + $0x40] sm:$0xff] }
  0x2f   : > { %900 = vmatpush1.bf16.msra.mxu1 %v899_v16  ;;  %870 = vmatprep.subr.bf16.mxu0 %v869_v17  ;;  %v913_v54 = vpack.c.bf16 %v250_v48, %v246_v47  ;;  %v249_v56 = vld [vmem:[%s1503_s2 + $0x60] sm:$0xff]  ;;  %v247_v57 = vld [vmem:[%s1503_s2 + $0x50] sm:$0xff]  ;;  %v945_v58 = vpack.c.bf16 %v252_v50, %v248_v49  ;;  %v254_v60 = vld [vmem:[%s1503_s2 + $0x88] sm:$0xff] }
  0x30   : > { %902 = vmatprep.subr.bf16.mxu1 %v901_v21  ;;  %v251_v59 = vld [vmem:[%s1503_s2 + $0x70] sm:$0xff]  ;;  %v258_v61 = vld [vmem:[%s1503_s2 + $0xa8] sm:$0xff]  ;;  %v256_v62 = vld [vmem:[%s1503_s2 + $0x98] sm:$0xff]  ;;  %v915_v0 = vpack.c.bf16 %v249_v56, %v245_v55 }
  0x31   : > { %v260_v63 = vld [vmem:[%s1503_s2 + $0xb8] sm:$0xff]  ;;  %v947_v1 = vpack.c.bf16 %v251_v59, %v247_v57  ;;  %v917_v2 = vpack.c.bf16 %v258_v61, %v254_v60  ;;  %v253_v3 = vld [vmem:[%s1503_s2 + $0x80] sm:$0xff]  ;;  %v255_v5 = vld [vmem:[%s1503_s2 + $0x90] sm:$0xff] }
  0x32   : > { %872 = vmatpush1.bf16.msra.mxu0 %v871_v27  ;;  %v257_v4 = vld [vmem:[%s1503_s2 + $0xa0] sm:$0xff]  ;;  %v949_v6 = vpack.c.bf16 %v260_v63, %v256_v62  ;;  %v259_v7 = vld [vmem:[%s1503_s2 + $0xb0] sm:$0xff]  ;;  %v262_v9 = vld [vmem:[%s1503_s2 + $0xc8] sm:$0xff] }
  0x33   : > { %904 = vmatpush1.bf16.msra.mxu1 %v903_v28  ;;  %874 = vmatprep.subr.bf16.mxu0 %v873_v29  ;;  %v266_v10 = vld [vmem:[%s1503_s2 + $0xe8] sm:$0xff]  ;;  %v264_v11 = vld [vmem:[%s1503_s2 + $0xd8] sm:$0xff]  ;;  %v919_v13 = vpack.c.bf16 %v257_v4, %v253_v3  ;;  %v261_v15 = vld [vmem:[%s1503_s2 + $0xc0] sm:$0xff]  ;;  %v951_v17 = vpack.c.bf16 %v259_v7, %v255_v5 }
  0x34   : > { %906 = vmatprep.subr.bf16.mxu1 %v905_v33  ;;  %v268_v12 = vld [vmem:[%s1503_s2 + $0xf8] sm:$0xff]  ;;  %v236_v16 = vld [vmem:[#allocation2 + $0x8] sm:$0xff]  ;;  %v921_v18 = vpack.c.bf16 %v266_v10, %v262_v9  ;;  %v265_v19 = vld [vmem:[%s1503_s2 + $0xe0] sm:$0xff] }
  0x35   : > { %v263_v20 = vld [vmem:[%s1503_s2 + $0xd0] sm:$0xff]  ;;  %v953_v22 = vpack.c.bf16 %v268_v12, %v264_v11  ;;  %v270_v23 = vld [vmem:[%s1503_s2 + $0x108] sm:$0xff]  ;;  %v272_v26 = vld [vmem:[%s1503_s2 + $0x118] sm:$0xff]  ;;  %v923_v28 = vpack.c.bf16 %v265_v19, %v261_v15 }
  0x36   : > { %876 = vmatpush1.bf16.msra.mxu0 %v875_v39  ;;  %v267_v21 = vld [vmem:[%s1503_s2 + $0xf0] sm:$0xff]  ;;  %v274_v24 = vld [vmem:[%s1503_s2 + $0x128] sm:$0xff]  ;;  %v276_v27 = vld [vmem:[%s1503_s2 + $0x138] sm:$0xff] }
  0x37   : > { %908 = vmatpush1.bf16.msra.mxu1 %v907_v40  ;;  %910 = vmatprep.subr.bf16.mxu0 %v909_v41  ;;  %v955_v29 = vpack.c.bf16 %v267_v21, %v263_v20  ;;  %v757_v30 = vld [vmem:[%s1502_s1] sm:$0xff]  ;;  %v758_v31 = vld [vmem:[%s1502_s1 + $0x8] sm:$0xff]  ;;  %v925_v32 = vpack.c.bf16 %v274_v24, %v270_v23  ;;  %v271_v35 = vld [vmem:[%s1503_s2 + $0x110] sm:$0xff]  ;;  %v957_v36 = vpack.c.bf16 %v276_v27, %v272_v26 }
  0x38   : > { %942 = vmatprep.subr.bf16.mxu1 %v941_v45  ;;  %v269_v33 = vld [vmem:[%s1503_s2 + $0x100] sm:$0xff]  ;;  %vm760_vm0 = vcmp.gt.s32.totalorder %v757_v30, %v759_v25  ;;  %vm761_vm1 = vcmp.gt.s32.totalorder %v758_v31, %v759_v25  ;;  %v275_v37 = vld [vmem:[%s1503_s2 + $0x130] sm:$0xff]  ;;  %v278_v38 = vld [vmem:[%s1503_s2 + $0x148] sm:$0xff] }
  0x39   : > { %430 = vmatmul.mubr.f32.vlgmr.msra.gmra.mrb[0].mxu0 %v235_v51  ;;  %v273_v34 = vld [vmem:[%s1503_s2 + $0x120] sm:$0xff]  ;;  %v282_v39 = vld [vmem:[%s1503_s2 + $0x168] sm:$0xff]  ;;  %v762_v40 = vsel %vm760_vm0, 1, %v1035_v14  ;;  %v280_v41 = vld [vmem:[%s1503_s2 + $0x158] sm:$0xff]  ;;  %v763_v44 = vsel %vm761_vm1, 1, %v1035_v14  ;;  %v959_v45 = vpack.c.bf16 %v275_v37, %v271_v35 }
  0x3a   : > { %507 = vmatmul.mubr.f32.vlgmr.msra.gmra.mrb[0].mxu1 %v235_v51  ;;  %912 = vmatpush1.bf16.msra.mxu0 %v911_v52  ;;  %v284_v42 = vld [vmem:[%s1503_s2 + $0x178] sm:$0xff]  ;;  %v927_v43 = vpack.c.bf16 %v273_v34, %v269_v33  ;;  %v929_v46 = vpack.c.bf16 %v282_v39, %v278_v38  ;;  %v277_v47 = vld [vmem:[%s1503_s2 + $0x140] sm:$0xff]  ;;  %v279_v49 = vld [vmem:[%s1503_s2 + $0x150] sm:$0xff] }
  0x3b   : > { %944 = vmatpush1.bf16.msra.mxu1 %v943_v53  ;;  %914 = vmatprep.subr.bf16.mxu0 %v913_v54  ;;  %v281_v48 = vld [vmem:[%s1503_s2 + $0x160] sm:$0xff]  ;;  %v961_v50 = vpack.c.bf16 %v284_v42, %v280_v41  ;;  %v283_v14 = vld [vmem:[%s1503_s2 + $0x170] sm:$0xff]  ;;  %v286_v51 = vld [vmem:[%s1503_s2 + $0x188] sm:$0xff] }
  0x3c   : > { %946 = vmatprep.subr.bf16.mxu1 %v945_v58  ;;  %435 = vmatprep.mubr.f32.mxu0 %v1034_v8  ;;  %v290_v52 = vld [vmem:[%s1503_s2 + $0x1a8] sm:$0xff]  ;;  %v288_v53 = vld [vmem:[%s1503_s2 + $0x198] sm:$0xff]  ;;  %v931_v55 = vpack.c.bf16 %v281_v48, %v277_v47  ;;  %v963_v56 = vpack.c.bf16 %v283_v14, %v279_v49  ;;  %v285_v58 = vld [vmem:[%s1503_s2 + $0x180] sm:$0xff] }
  0x3d   : > { %512 = vmatprep.mubr.f32.mxu1 %v1034_v8  ;;  %436 = vmatmul.mubr.f32.gmra.mrb[2].mxu0 %v236_v16  ;;  %v292_v54 = vld [vmem:[%s1503_s2 + $0x1b8] sm:$0xff]  ;;  %v933_v57 = vpack.c.bf16 %v290_v52, %v286_v51  ;;  %v289_v59 = vld [vmem:[%s1503_s2 + $0x1a0] sm:$0xff]  ;;  %v287_v60 = vld [vmem:[%s1503_s2 + $0x190] sm:$0xff] }
  0x3e   : > { %916 = vmatpush1.bf16.msra.mxu0 %v915_v0  ;;  %513 = vmatmul.mubr.f32.gmra.mrb[2].mxu1 %v236_v16  ;;  %v965_v61 = vpack.c.bf16 %v292_v54, %v288_v53  ;;  %v291_v62 = vld [vmem:[%s1503_s2 + $0x1b0] sm:$0xff]  ;;  %v294_v63 = vld [vmem:[%s1503_s2 + $0x1c8] sm:$0xff]  ;;  %v935_v3 = vpack.c.bf16 %v289_v59, %v285_v58  ;;  %v297_v7 = vld [vmem:[%s1503_s2 + $0x1e0] sm:$0xff] }
  0x3f   : > { %948 = vmatpush1.bf16.msra.mxu1 %v947_v1  ;;  %918 = vmatprep.subr.bf16.mxu0 %v917_v2  ;;  %v298_v0 = vld [vmem:[%s1503_s2 + $0x1e8] sm:$0xff]  ;;  %v296_v1 = vld [vmem:[%s1503_s2 + $0x1d8] sm:$0xff]  ;;  %v967_v4 = vpack.c.bf16 %v291_v62, %v287_v60  ;;  %v295_v10 = vld [vmem:[%s1503_s2 + $0x1d0] sm:$0xff] }
  0x40   : > { %950 = vmatprep.subr.bf16.mxu1 %v949_v6  ;;  %583 = vmatprep.mubr.f32.mxu0 %v1034_v8  ;;  %v300_v2 = vld [vmem:[%s1503_s2 + $0x1f8] sm:$0xff]  ;;  %v937_v5 = vpack.c.bf16 %v298_v0, %v294_v63  ;;  %v293_v6 = vld [vmem:[%s1503_s2 + $0x1c0] sm:$0xff]  ;;  %v299_v11 = vld [vmem:[%s1503_s2 + $0x1f0] sm:$0xff] }
  0x41   : > { %660 = vmatprep.mubr.f32.mxu1 %v1034_v8  ;;  %765 = vperm.xlu0 %992, %v762_v40   ;;  %v969_v9 = vpack.c.bf16 %v300_v2, %v296_v1  ;;  %v939_v12 = vpack.c.bf16 %v297_v7, %v293_v6  ;;  %v233_v15 = vld [vmem:[%s1081_s24] sm:$0xff]  ;;  %v234_v16 = vld [vmem:[%s1081_s24 + $0x8] sm:$0xff]  ;;  %v741_v0 = vld [vmem:[#allocation3] sm:$0xff] }
  0x42   : > { %920 = vmatpush1.bf16.msra.mxu0 %v919_v13  ;;  %v971_v13 = vpack.c.bf16 %v299_v11, %v295_v10  ;;  %v673_v20 = vld [vmem:[%s1505_s4] sm:$0xf] }
  0x43   : > { %952 = vmatpush1.bf16.msra.mxu1 %v951_v17  ;;  %922 = vmatprep.subr.bf16.mxu0 %v921_v18  ;;  %v675_v17 = vlaneseq }
  0x44   : > { %954 = vmatprep.subr.bf16.mxu1 %v953_v22 }
  0x45   : > { %768 = vperm.xlu0 %992, %v763_v44   ;;  %v676_v18 = vshrl.u32 %v675_v17, 7 }
  0x46   : > { %924 = vmatpush1.bf16.msra.mxu0 %v923_v28 }
  0x47   : > { %956 = vmatpush1.bf16.msra.mxu1 %v955_v29  ;;  %926 = vmatprep.subr.bf16.mxu0 %v925_v32  ;;  %v677_v19 = vsub.s32 0, %v676_v18  ;;  %v681_v21 = vsub.s32 1, %v676_v18  ;;  %v689_v24 = vsub.s32 3, %v676_v18  ;;  %v685_v42 = vsub.s32 2, %v676_v18 }
  0x48   : > { %958 = vmatprep.subr.bf16.mxu1 %v957_v36 }
  0x49   : > { %v678_v22 = vrot.slane %v673_v20, %v677_v19  ;;  %v682_v23 = vrot.slane %v673_v20, %v681_v21  ;;  %v686_v49 = vrot.slane %v673_v20, %v685_v42 }
  0x4a   : > { %928 = vmatpush1.bf16.msra.mxu0 %v927_v43 }
  0x4b   : > { %960 = vmatpush1.bf16.msra.mxu1 %v959_v45  ;;  %930 = vmatprep.subr.bf16.mxu0 %v929_v46 }
  0x4c   : > { %962 = vmatprep.subr.bf16.mxu1 %v961_v50 }
  0x4e   : > { %932 = vmatpush1.bf16.msra.mxu0 %v931_v55 }
  0x4f   : > { %964 = vmatpush1.bf16.msra.mxu1 %v963_v56  ;;  %934 = vmatprep.subr.bf16.mxu0 %v933_v57 }
  0x50   : > { %966 = vmatprep.subr.bf16.mxu1 %v965_v61 }
  0x52   : > { %936 = vmatpush1.bf16.msra.mxu0 %v935_v3 }
  0x53   : > { %968 = vmatpush1.bf16.msra.mxu1 %v967_v4  ;;  %938 = vmatprep.subr.bf16.mxu0 %v937_v5 }
  0x54   : > { %970 = vmatprep.subr.bf16.mxu1 %v969_v9  ;;  %v742_v9 = vld [vmem:[#allocation3 + $0x8] sm:$0xff] }
  0x56   : > { %940 = vmatpush1.bf16.msra.mxu0 %v939_v12 }
  0x57   : > { %972 = vmatpush1.bf16.msra.mxu1 %v971_v13 }
  0x59   : > { %584 = vmatmul.mubr.f32.vlgmr.msra.gmra.mrb[0].mxu0 %v233_v15 }
  0x5a   : > { %661 = vmatmul.mubr.f32.vlgmr.msra.gmra.mrb[0].mxu1 %v233_v15  ;;  %589 = vmatprep.mubr.f32.mxu0 %v1034_v8 }
  0x5b   : > { %666 = vmatprep.mubr.f32.mxu1 %v1034_v8  ;;  %v690_v8 = vrot.slane %v673_v20, %v689_v24 }
  0x5d   : > { %590 = vmatmul.mubr.f32.gmra.mrb[2].mxu0 %v234_v16 }
  0x5e   : > { %667 = vmatmul.mubr.f32.gmra.mrb[2].mxu1 %v234_v16 }
  0xc0   : > { %v766_v18 = vpop.permute.xlu0 %765 }
  0xc1   : > { %vm770_vm2 = vcmp.eq.s32.totalorder %v766_v18, 1 }
  0xc4   : > { %v769_v24 = vpop.permute.xlu0 %768 }
  0xc5   : > { %vm771_vm3 = vcmp.eq.s32.totalorder %v769_v24, 1 }
 0x12c   : > { %v585_v25 = vpop.f32.mrb[0].mxu0 }
 0x12d   : > { %v695_v26 = vadd.f32 %v678_v22, %v585_v25  ;;  %v662_v27 = vpop.f32.mrb[0].mxu1  ;;  %v587_v28 = vpop.f32.mrb[1].mxu0 }
 0x12e   : > { %v696_v29 = vadd.f32 %v682_v23, %v587_v28  ;;  %v664_v30 = vpop.f32.mrb[1].mxu1  ;;  %v697_v51 = vadd.f32 %v686_v49, %v662_v27 }
 0x12f   : > { %v703_v31 = vsub.f32 0.0, %v695_v26  ;;  %v698_v39 = vadd.f32 %v690_v8, %v664_v30 }
 0x130   : > { %v715_v32 = vsub.f32 0.0, %v696_v29  ;;  %v591_v33 = vpop.f32.mrb[2].mxu0 }
 0x131   : > { %v705_v34 = vmul.f32 1.442695, %v703_v31  ;;  %v699_v35 = vadd.f32 %v678_v22, %v591_v33  ;;  %v593_v36 = vpop.f32.mrb[3].mxu0  ;;  %v668_v37 = vpop.f32.mrb[2].mxu1  ;;  %v729_v46 = vsub.f32 0.0, %v698_v39 }
 0x132   : > { %v717_v38 = vmul.f32 1.442695, %v715_v32  ;;  %v700_v40 = vadd.f32 %v682_v23, %v593_v36  ;;  %v670_v41 = vpop.f32.mrb[3].mxu1  ;;  %v701_v57 = vadd.f32 %v686_v49, %v668_v37 }
 0x133   : > { %993 = vpow2.f32 %v705_v34  ;;  %v704_v43 = vsub.f32 0.0, %v699_v35  ;;  %v702_v48 = vadd.f32 %v690_v8, %v670_v41  ;;  %v731_v50 = vmul.f32 1.442695, %v729_v46 }
 0x134   : > { %995 = vpow2.f32 %v717_v38  ;;  %v716_v44 = vsub.f32 0.0, %v700_v40 }
 0x135   : > { %v707_v45 = vmul.f32 1.442695, %v704_v43  ;;  %v730_v14 = vsub.f32 0.0, %v702_v48 }
 0x136   : > { %v719_v47 = vmul.f32 1.442695, %v716_v44 }
 0x137   : > { %997 = vpow2.f32 %v707_v45  ;;  %v733_v55 = vmul.f32 1.442695, %v730_v14 }
 0x138   : > { %999 = vpow2.f32 %v719_v47 }
 0x139   : > { %1001 = vpow2.f32 %v731_v50 }
 0x13a   : > { %1003 = vtanh.f32 %v697_v51 }
 0x13d   : > { %v994_v52 = vpop.eup %993 }
 0x13e   : > { %v996_v53 = vpop.eup %995  ;;  %v709_v54 = vadd.f32 1.0, %v994_v52 }
 0x13f   : > { %v721_v56 = vadd.f32 1.0, %v996_v53 }
 0x140   : > { %1005 = vrcp.f32 %v709_v54 }
 0x141   : > { %v998_v58 = vpop.eup %997  ;;  %1007 = vrcp.f32 %v721_v56 }
 0x142   : > { %v1000_v59 = vpop.eup %999  ;;  %v710_v60 = vadd.f32 1.0, %v998_v58  ;;  %1009 = vpow2.f32 %v733_v55 }
 0x143   : > { %v722_v61 = vadd.f32 1.0, %v1000_v59  ;;  %1011 = vtanh.f32 %v701_v57  ;;  %v1002_v62 = vpop.eup %1001 }
 0x144   : > { %1013 = vrcp.f32 %v710_v60  ;;  %v1004_v63 = vpop.eup %1003  ;;  %v735_v4 = vadd.f32 1.0, %v1002_v62 }
 0x145   : > { %1015 = vrcp.f32 %v722_v61 }
 0x146   : > { %1017 = vrcp.f32 %v735_v4 }
 0x14a   : > { %v1006_v1 = vpop.eup %1005 }
 0x14b   : > { %v1008_v2 = vpop.eup %1007  ;;  %v745_v3 = vmul.f32 %v1006_v1, %v1004_v63 }
 0x14c   : > { %v1010_v5 = vpop.eup %1009  ;;  %v743_v6 = vmul.f32 %v1008_v2, %v741_v0 }
 0x14d   : > { %v1012_v7 = vpop.eup %1011  ;;  %v736_v15 = vadd.f32 1.0, %v1010_v5 }
 0x14e   : > { %v1014_v10 = vpop.eup %1013  ;;  %v747_v11 = vadd.f32 %v745_v3, %v743_v6 }
 0x14f   : > { %v1016_v12 = vpop.eup %1015  ;;  %v746_v13 = vmul.f32 %v1014_v10, %v1012_v7 }
 0x150   : > { %v744_v16 = vmul.f32 %v1016_v12, %v742_v9  ;;  %1019 = vtanh.f32 %v747_v11  ;;  %755 = vst [vmem:[#allocation3] sm:$0xff] %v747_v11  ;;  %v1018_v19 = vpop.eup %1017 }
 0x151   : > { %1021 = vrcp.f32 %v736_v15 }
 0x152   : > { %v748_v17 = vadd.f32 %v746_v13, %v744_v16 }
 0x154   : > { %756 = vst [vmem:[#allocation3 + $0x8] sm:$0xff] %v748_v17  ;;  %1023 = vtanh.f32 %v748_v17 }
 0x15a   : > { %v1020_v20 = vpop.eup %1019 }
 0x15b   : > { %v751_v21 = vmul.f32 %v1020_v20, %v1018_v19  ;;  %v1022_v22 = vpop.eup %1021 }
 0x15d   : > { %753 = vst [vmem:[#allocation2] sm:$0xff] %v751_v21  ;;  %v772_v23 = vsel %vm770_vm2, %v751_v21, 0.0 }
 0x15e   : > { %v1024_v25 = vpop.eup %1023  ;;  %774 = vst [vmem:[%s1086_s27] sm:$0xff] %v772_v23 }
 0x15f   : > { %v752_v26 = vmul.f32 %v1024_v25, %v1022_v22 }
 0x161   : > { %754 = vst [vmem:[#allocation2 + $0x8] sm:$0xff] %v752_v26  ;;  %v773_v27 = vsel %vm771_vm3, %v752_v26, 0.0 }
 0x162   : > { %775 = vst [vmem:[%s1086_s27 + $0x8] sm:$0xff] %v773_v27 }
 0x163 PF: > { %s15_s18 = sadd.s32 1, %s1031_s18  }
 0x164   : > { %p12_p5 = scmp.ge.s32.totalorder %s15_s18, 10  }
 0x166   :  { %14 = sbr.rel (!%p12_p5) target bundleno = 1 (0x1), region = 74 }

</bundles_post_ra>
